<compile_context>
chip_gen: v6e
topology: v6e:2x2x1
jax: 0.10.0
libtpu: 0.0.40
codegen_flags: <defaults>
</compile_context>

<pallas_src>
import functools

import jax
import jax.numpy as jnp
from jax.experimental import pallas as pl
from jax.experimental.pallas import tpu as pltpu

LANE = 128
SUBLANE = 8
MAX_TILE_ROWS = 1024   # (1024,128) f32 tile = 512 KiB; 2 inputs x 2 buffers = 2 MiB VMEM


def _detect_num_tensorcores():
    """Best-effort TensorCores-per-device count (1 on v5e/v6e, 2 on v7x).

    Falls back to 1 (always safe) if the query or the field name is unavailable.
    """
    # TODO(synk): confirm the TpuInfo field name for TCs/chip on v7x; callers can
    # always pass num_core_splits explicitly.
    try:
        info = pltpu.get_tpu_info()
        for attr in ("num_cores", "core_count", "num_tensorcores",
                     "tensorcores_per_chip", "cores_per_chip"):
            n = getattr(info, attr, None)
            if isinstance(n, int) and n > 0:
                return max(1, min(2, n))
    except Exception:
        pass
    return 1


def _focal_dice_partial_kernel(sel_ref, p_ref, t_ref, acc_ref, *,
                               alpha, gamma, tm, blocks_per_core, valid_rows,
                               needs_mask, binary_targets, reduce_on_mxu):
    """Accumulate [focal_sum, sum(p*t), sum(p+t)] as (8,128) vector partials."""
    c = pl.program_id(0)
    j = pl.program_id(1)

    @pl.when(j == 0)
    def _init():
        acc_ref[...] = jnp.zeros_like(acc_ref)

    p_raw = p_ref[...].astype(jnp.float32)
    t_raw = t_ref[...].astype(jnp.float32)
    sel = sel_ref[...] if reduce_on_mxu else None   # (8, tm): row 0 = ones

    def accumulate(p, t):
        one_m_t = 1.0 - t
        one_m_p = 1.0 - p
        p_t = p * t + one_m_p * one_m_t
        one_m_pt = 1.0 - p_t

        if gamma == 2.0:
            mod = one_m_pt * one_m_pt               # no exp/log pair on the EUP
        elif float(gamma).is_integer() and gamma >= 0:
            mod = jnp.ones_like(one_m_pt)
            for _ in range(int(gamma)):             # repeated multiplies
                mod = mod * one_m_pt
        else:
            mod = jnp.power(one_m_pt, gamma)

        if binary_targets:
            # For t in {0,1}: BCE == -clamp(log(p_t), -100) -> one log instead of
            # two, and alpha_t fuses into the modulating weight.
            log_pt = jnp.maximum(jnp.log(p_t), -100.0)
            w = mod
            if alpha >= 0:
                alpha_t = (1.0 - alpha) + (2.0 * alpha - 1.0) * t
                w = alpha_t * mod
            focal = -w * log_pt
        else:
            # torch.nn.functional.binary_cross_entropy with its log clamp at -100.
            log_p = jnp.maximum(jnp.log(p), -100.0)
            log_1mp = jnp.maximum(jnp.log(1.0 - p), -100.0)
            ce = -(t * log_p + one_m_t * log_1mp)
            focal = ce * mod
            if alpha >= 0:
                alpha_t = (1.0 - alpha) + (2.0 * alpha - 1.0) * t
                focal = alpha_t * focal

        inter = p * t
        total = p + t

        if reduce_on_mxu:
            # Row reduction on the otherwise-idle MXU: sel row 0 is ones, rows
            # 1..7 are zeros, so dot(sel, x) puts the column sums in sublane 0
            # and zeros elsewhere -- a full (8,128) accumulate, no VALU adds and
            # no partial-sublane stores.
            acc_ref[0, 0, :, :] += jnp.dot(sel, focal, preferred_element_type=jnp.float32)
            acc_ref[0, 1, :, :] += jnp.dot(sel, inter, preferred_element_type=jnp.float32)
            acc_ref[0, 2, :, :] += jnp.dot(sel, total, preferred_element_type=jnp.float32)
        else:
            nsub = tm // SUBLANE
            acc_ref[0, 0, :, :] += focal.reshape(nsub, SUBLANE, LANE).sum(axis=0)
            acc_ref[0, 1, :, :] += inter.reshape(nsub, SUBLANE, LANE).sum(axis=0)
            acc_ref[0, 2, :, :] += total.reshape(nsub, SUBLANE, LANE).sum(axis=0)

    if needs_mask:
        # Only the tail (or clamped-duplicate) block pays for masking; every full
        # block takes the unmasked branch.
        row0 = (c * blocks_per_core + j) * tm
        is_tail = row0 + tm > valid_rows

        @pl.when(jnp.logical_not(is_tail))
        def _full():
            accumulate(p_raw, t_raw)

        @pl.when(is_tail)
        def _tail():
            # Loop-invariant iota; only the comparison limit depends on the step.
            rows = jax.lax.broadcasted_iota(jnp.int32, (tm, LANE), 0)
            valid = rows < (valid_rows - row0)
            # p=t=0 contributes exactly 0 to all three sums (log clamp -> ce = 0;
            # p_t = 1 -> log(p_t) = 0 on the binary fast path).
            accumulate(jnp.where(valid, p_raw, 0.0),
                       jnp.where(valid, t_raw, 0.0))
    else:
        accumulate(p_raw, t_raw)


def focal_dice_loss(inputs, targets, *, alpha=0.25, gamma=2.0, smooth=1e-6,
                    focal_weight=1.0, dice_weight=1.0,
                    assume_binary_targets=False, reduce_on_mxu=True,
                    num_core_splits=None, max_tile_rows=MAX_TILE_ROWS):
    """Pallas equivalent of FocalDiceLoss(reduction='mean', dynamic_alpha=False).

    Inputs/targets are streamed in their native dtype and cast to f32 in-kernel;
    pass bf16 probabilities/targets to halve HBM traffic.
    """
    # TODO(synk): dynamic_alpha=True and reduction='none'/'sum' variants are not
    # implemented (module defaults are dynamic_alpha=False, reduction='mean').
    assert inputs.shape == targets.shape
    assert max_tile_rows % SUBLANE == 0
    n_elems = 1
    for d in inputs.shape:
        n_elems *= int(d)

    tile_elems = SUBLANE * LANE
    if n_elems % tile_elems == 0:
        # Common case: pure reshape, no pad / no dtype copy in HBM.
        # TODO(synk): for awkward trailing dims (e.g. NCHW with W=16) XLA's tiled
        # HBM layout can make this reshape a padded relayout copy; hot-path
        # callers should hand in a 128-friendly (or 1-D) layout.
        padded = n_elems
        p2 = jnp.reshape(inputs, (-1, LANE))
        t2 = jnp.reshape(targets, (-1, LANE))
    else:
        # Ragged totals take one jnp.pad copy; zero padding contributes exactly 0
        # to every accumulator (log clamp -> ce = 0; p_t = 1 -> log(p_t) = 0).
        padded = pl.cdiv(n_elems, tile_elems) * tile_elems
        pad = padded - n_elems
        p2 = jnp.pad(jnp.ravel(inputs), (0, pad)).reshape(-1, LANE)
        t2 = jnp.pad(jnp.ravel(targets), (0, pad)).reshape(-1, LANE)

    m = padded // LANE                                   # rows; multiple of 8
    tm = min(int(max_tile_rows), m)
    total_blocks = pl.cdiv(m, tm)

    splits = (num_core_splits if num_core_splits is not None
              else _detect_num_tensorcores())
    splits = max(1, min(int(splits), total_blocks))
    bpc = pl.cdiv(total_blocks, splits)                  # row-blocks per core slice
    needs_mask = (splits * bpc * tm) > m
    needs_clamp = (splits * bpc) > total_blocks

    if needs_clamp:
        def in_map(c, j):
            return (jnp.minimum(c * bpc + j, total_blocks - 1), 0)
    else:
        def in_map(c, j):
            return (c * bpc + j, 0)

    # Constant row-selector for the MXU reduction (row 0 = ones).  Passed as an
    # input with a constant index_map so it is copied in once and stays resident.
    sel = jnp.zeros((SUBLANE, tm), jnp.float32).at[0, :].set(1.0)

    kernel = functools.partial(
        _focal_dice_partial_kernel,
        alpha=float(alpha), gamma=float(gamma), tm=tm,
        blocks_per_core=bpc, valid_rows=m, needs_mask=needs_mask,
        binary_targets=bool(assume_binary_targets),
        reduce_on_mxu=bool(reduce_on_mxu))

    in_bytes = p2.dtype.itemsize + t2.dtype.itemsize
    cost = pl.CostEstimate(
        flops=(68 if reduce_on_mxu else 24) * padded,
        transcendentals=(1 if assume_binary_targets else 2) * padded,
        bytes_accessed=padded * in_bytes
        + splits * 3 * SUBLANE * LANE * 4 + SUBLANE * tm * 4)

    if splits > 1:
        # Genuinely shard the streaming loop across TensorCores (v7x); plain
        # "parallel" does not change codegen for this.
        dim_sem = (getattr(pltpu, "CORE_PARALLEL", "parallel"),
                   getattr(pltpu, "ARBITRARY", "arbitrary"))
    else:
        dim_sem = ("arbitrary", "arbitrary")

    partial = pl.pallas_call(
        kernel,
        out_shape=jax.ShapeDtypeStruct((splits, 3, SUBLANE, LANE), jnp.float32),
        grid_spec=pltpu.PrefetchScalarGridSpec(
            num_scalar_prefetch=0,
            grid=(splits, bpc),
            in_specs=[pl.BlockSpec((SUBLANE, tm), lambda c, j: (0, 0)),
                      pl.BlockSpec((tm, LANE), in_map),
                      pl.BlockSpec((tm, LANE), in_map)],
            out_specs=pl.BlockSpec((1, 3, SUBLANE, LANE),
                                   lambda c, j: (c, 0, 0, 0))),
        compiler_params=pltpu.CompilerParams(dimension_semantics=dim_sem),
        cost_estimate=cost,
    )(sel, p2, t2)

    # Single cross-lane reduce + scalar combine, once, outside the streaming loop.
    sums = jnp.sum(partial, axis=(0, 2, 3))              # [focal_sum, inter, total]
    focal_mean = sums[0] / jnp.float32(n_elems)          # reduction='mean'
    dice = 1.0 - (2.0 * sums[1] + smooth) / (sums[2] + smooth)
    return focal_weight * focal_mean + dice_weight * dice


def _reference(inputs, targets, *, alpha=0.25, gamma=2.0, smooth=1e-6,
               focal_weight=1.0, dice_weight=1.0):
    p = inputs.astype(jnp.float32)
    t = targets.astype(jnp.float32)
    log_p = jnp.maximum(jnp.log(p), -100.0)
    log_1mp = jnp.maximum(jnp.log(1.0 - p), -100.0)
    ce = -(t * log_p + (1.0 - t) * log_1mp)
    p_t = p * t + (1.0 - p) * (1.0 - t)
    focal = ce * (1.0 - p_t) ** gamma
    alpha_t = alpha * t + (1.0 - alpha) * (1.0 - t)
    focal = (alpha_t * focal).mean()
    inter = (p * t).sum()
    total = p.sum() + t.sum()
    dice = 1.0 - (2.0 * inter + smooth) / (total + smooth)
    return focal_weight * focal + dice_weight * dice


if __name__ == "__main__":
    key = jax.random.PRNGKey(0)
    k1, k2, k3, k4 = jax.random.split(key, 4)

    N, C, H, W = 2, 4, 16, 16
    # inputs are probabilities (the torch module applies binary_cross_entropy to p)
    inputs = jax.nn.sigmoid(jax.random.normal(k1, (N, C, H, W), dtype=jnp.float32))
    targets = (jax.random.uniform(k2, (N, C, H, W)) > 0.5).astype(jnp.float32)
    ref = _reference(inputs, targets)

    # Default path: MXU row reduction, general (non-binary-assuming) CE.
    # Tolerance covers MXU f32 multi-pass accumulation / summation-order effects.
    loss = jax.block_until_ready(focal_dice_loss(inputs, targets))
    assert jnp.allclose(loss, ref, atol=2e-3, rtol=2e-3), (loss, ref)

    # VALU-reduction path matches the reference tightly (pure f32 vector adds).
    loss_valu = jax.block_until_ready(
        focal_dice_loss(inputs, targets, reduce_on_mxu=False))
    assert jnp.allclose(loss_valu, ref, atol=1e-4, rtol=1e-4), (loss_valu, ref)

    # Binary-target fast path (single-log CE + fused alpha weights).
    loss_fast = jax.block_until_ready(
        focal_dice_loss(inputs, targets, assume_binary_targets=True))
    assert jnp.allclose(loss_fast, ref, atol=2e-3, rtol=2e-3), (loss_fast, ref)

    # Multi-block streaming with a ragged tail block (tail-confined mask path);
    # num_core_splits pinned to 1 so the test is deterministic w.r.t. core count.
    H2, W2 = 16, 24
    inputs2 = jax.nn.sigmoid(jax.random.normal(k3, (N, C, H2, W2), dtype=jnp.float32))
    targets2 = (jax.random.uniform(k4, (N, C, H2, W2)) > 0.5).astype(jnp.float32)
    loss2 = jax.block_until_ready(
        focal_dice_loss(inputs2, targets2, max_tile_rows=16, num_core_splits=1))
    ref2 = _reference(inputs2, targets2)
    assert jnp.allclose(loss2, ref2, atol=2e-3, rtol=2e-3), (loss2, ref2)

    print("KERNEL_OK")
</pallas_src>

<mosaic_0001>
module attributes {stable_mosaic.version = 11 : i64} {
  func.func @_focal_dice_partial_kernel(%arg0: i32, %arg1: i32, %arg2: memref<8x16xf32, #tpu.memory_space<vmem>>, %arg3: memref<16x128xf32, #tpu.memory_space<vmem>>, %arg4: memref<16x128xf32, #tpu.memory_space<vmem>>, %arg5: memref<1x3x8x128xf32, #tpu.memory_space<vmem>>) attributes {dimension_semantics = [#tpu.dimension_semantics<arbitrary>, #tpu.dimension_semantics<arbitrary>], iteration_bounds = array<i64: 1, 1>, scalar_prefetch = 0 : i64, scratch_operands = 0 : i64, tpu.core_type = #tpu.core_type<tc>, window_params = [{pipeline_mode = #tpu.pipeline_mode<synchronous>, transform_indices = @transform_0, window_bounds = array<i64: 8, 16>}, {transform_indices = @transform_1, window_bounds = array<i64: 16, 128>}, {transform_indices = @transform_2, window_bounds = array<i64: 16, 128>}, {transform_indices = @transform_3, window_bounds = array<i64: 1, 3, 8, 128>}]} {
    %c0_i32 = arith.constant 0 : i32
    %0 = arith.cmpi eq, %arg1, %c0_i32 : i32
    %1 = arith.extui %0 : i1 to i32
    %c0_i32_0 = arith.constant 0 : i32
    %2 = arith.cmpi ne, %1, %c0_i32_0 : i32
    scf.if %2 {
      %cst_39 = arith.constant 0.000000e+00 : f32
      %58 = vector.broadcast %cst_39 : f32 to vector<1x3x8x128xf32>
      %c0_40 = arith.constant 0 : index
      %c0_41 = arith.constant 0 : index
      %c0_42 = arith.constant 0 : index
      %c0_43 = arith.constant 0 : index
      %59 = vector.load %arg5[%c0_40, %c0_41, %c0_42, %c0_43] : memref<1x3x8x128xf32, #tpu.memory_space<vmem>>, vector<1x3x8x128xf32>
      tpu.vector_store %arg5[%c0_40, %c0_41, %c0_42, %c0_43], %58 {strides = array<i32>} : memref<1x3x8x128xf32, #tpu.memory_space<vmem>>, vector<1x3x8x128xf32>,
    } else {
    }
    %c0 = arith.constant 0 : index
    %c0_1 = arith.constant 0 : index
    %3 = vector.load %arg3[%c0, %c0_1] : memref<16x128xf32, #tpu.memory_space<vmem>>, vector<16x128xf32>
    %c0_2 = arith.constant 0 : index
    %c0_3 = arith.constant 0 : index
    %4 = vector.load %arg4[%c0_2, %c0_3] : memref<16x128xf32, #tpu.memory_space<vmem>>, vector<16x128xf32>
    %c0_4 = arith.constant 0 : index
    %c0_5 = arith.constant 0 : index
    %5 = vector.load %arg2[%c0_4, %c0_5] : memref<8x16xf32, #tpu.memory_space<vmem>>, vector<8x16xf32>
    %cst = arith.constant 1.000000e+00 : f32
    %6 = vector.broadcast %cst : f32 to vector<16x128xf32>
    %7 = arith.subf %6, %4 : vector<16x128xf32>
    %cst_6 = arith.constant 1.000000e+00 : f32
    %8 = vector.broadcast %cst_6 : f32 to vector<16x128xf32>
    %9 = arith.subf %8, %3 : vector<16x128xf32>
    %10 = arith.mulf %3, %4 : vector<16x128xf32>
    %11 = arith.mulf %9, %7 : vector<16x128xf32>
    %12 = arith.addf %10, %11 : vector<16x128xf32>
    %cst_7 = arith.constant 1.000000e+00 : f32
    %13 = vector.broadcast %cst_7 : f32 to vector<16x128xf32>
    %14 = arith.subf %13, %12 : vector<16x128xf32>
    %15 = arith.mulf %14, %14 : vector<16x128xf32>
    %16 = math.log %3 : vector<16x128xf32>
    %cst_8 = arith.constant -1.000000e+02 : f32
    %17 = vector.broadcast %cst_8 : f32 to vector<16x128xf32>
    %18 = arith.maximumf %16, %17 : vector<16x128xf32>
    %cst_9 = arith.constant 1.000000e+00 : f32
    %19 = vector.broadcast %cst_9 : f32 to vector<16x128xf32>
    %20 = arith.subf %19, %3 : vector<16x128xf32>
    %21 = math.log %20 : vector<16x128xf32>
    %cst_10 = arith.constant -1.000000e+02 : f32
    %22 = vector.broadcast %cst_10 : f32 to vector<16x128xf32>
    %23 = arith.maximumf %21, %22 : vector<16x128xf32>
    %24 = arith.mulf %4, %18 : vector<16x128xf32>
    %25 = arith.mulf %7, %23 : vector<16x128xf32>
    %26 = arith.addf %24, %25 : vector<16x128xf32>
    %cst_11 = arith.constant 0.000000e+00 : f32
    %27 = vector.broadcast %cst_11 : f32 to vector<16x128xf32>
    %28 = arith.subf %27, %26 : vector<16x128xf32>
    %29 = arith.mulf %28, %15 : vector<16x128xf32>
    %cst_12 = arith.constant -5.000000e-01 : f32
    %30 = vector.broadcast %cst_12 : f32 to vector<16x128xf32>
    %31 = arith.mulf %30, %4 : vector<16x128xf32>
    %cst_13 = arith.constant 7.500000e-01 : f32
    %32 = vector.broadcast %cst_13 : f32 to vector<16x128xf32>
    %33 = arith.addf %32, %31 : vector<16x128xf32>
    %34 = arith.mulf %33, %29 : vector<16x128xf32>
    %35 = arith.mulf %3, %4 : vector<16x128xf32>
    %36 = arith.addf %3, %4 : vector<16x128xf32>
    %c0_14 = arith.constant 0 : index
    %c0_15 = arith.constant 0 : index
    %c0_16 = arith.constant 0 : index
    %c0_17 = arith.constant 0 : index
    %37 = vector.load %arg5[%c0_14, %c0_15, %c0_16, %c0_17] : memref<1x3x8x128xf32, #tpu.memory_space<vmem>>, vector<1x1x8x128xf32>
    %38 = vector.shape_cast %37 : vector<1x1x8x128xf32> to vector<8x128xf32>
    %cst_18 = arith.constant dense<0.000000e+00> : vector<8x128xf32>
    %39 = tpu.matmul %5, %34, %cst_18 {dimension_numbers = #tpu.dot_dimension_numbers<[1], [0], [0], [1], [0, 0, 1, 1], [], []>} : vector<8x16xf32>, vector<16x128xf32>, vector<8x128xf32> -> vector<8x128xf32>
    %40 = arith.addf %38, %39 : vector<8x128xf32>
    %c0_19 = arith.constant 0 : index
    %c0_20 = arith.constant 0 : index
    %c0_21 = arith.constant 0 : index
    %c0_22 = arith.constant 0 : index
    %41 = vector.load %arg5[%c0_19, %c0_20, %c0_21, %c0_22] : memref<1x3x8x128xf32, #tpu.memory_space<vmem>>, vector<1x1x8x128xf32>
    %42 = vector.shape_cast %41 : vector<1x1x8x128xf32> to vector<8x128xf32>
    %43 = vector.shape_cast %40 : vector<8x128xf32> to vector<1x1x8x128xf32>
    tpu.vector_store %arg5[%c0_19, %c0_20, %c0_21, %c0_22], %43 {strides = array<i32>} : memref<1x3x8x128xf32, #tpu.memory_space<vmem>>, vector<1x1x8x128xf32>,
    %c0_23 = arith.constant 0 : index
    %c1 = arith.constant 1 : index
    %c0_24 = arith.constant 0 : index
    %c0_25 = arith.constant 0 : index
    %44 = vector.load %arg5[%c0_23, %c1, %c0_24, %c0_25] : memref<1x3x8x128xf32, #tpu.memory_space<vmem>>, vector<1x1x8x128xf32>
    %45 = vector.shape_cast %44 : vector<1x1x8x128xf32> to vector<8x128xf32>
    %cst_26 = arith.constant dense<0.000000e+00> : vector<8x128xf32>
    %46 = tpu.matmul %5, %35, %cst_26 {dimension_numbers = #tpu.dot_dimension_numbers<[1], [0], [0], [1], [0, 0, 1, 1], [], []>} : vector<8x16xf32>, vector<16x128xf32>, vector<8x128xf32> -> vector<8x128xf32>
    %47 = arith.addf %45, %46 : vector<8x128xf32>
    %c0_27 = arith.constant 0 : index
    %c1_28 = arith.constant 1 : index
    %c0_29 = arith.constant 0 : index
    %c0_30 = arith.constant 0 : index
    %48 = vector.load %arg5[%c0_27, %c1_28, %c0_29, %c0_30] : memref<1x3x8x128xf32, #tpu.memory_space<vmem>>, vector<1x1x8x128xf32>
    %49 = vector.shape_cast %48 : vector<1x1x8x128xf32> to vector<8x128xf32>
    %50 = vector.shape_cast %47 : vector<8x128xf32> to vector<1x1x8x128xf32>
    tpu.vector_store %arg5[%c0_27, %c1_28, %c0_29, %c0_30], %50 {strides = array<i32>} : memref<1x3x8x128xf32, #tpu.memory_space<vmem>>, vector<1x1x8x128xf32>,
    %c0_31 = arith.constant 0 : index
    %c2 = arith.constant 2 : index
    %c0_32 = arith.constant 0 : index
    %c0_33 = arith.constant 0 : index
    %51 = vector.load %arg5[%c0_31, %c2, %c0_32, %c0_33] : memref<1x3x8x128xf32, #tpu.memory_space<vmem>>, vector<1x1x8x128xf32>
    %52 = vector.shape_cast %51 : vector<1x1x8x128xf32> to vector<8x128xf32>
    %cst_34 = arith.constant dense<0.000000e+00> : vector<8x128xf32>
    %53 = tpu.matmul %5, %36, %cst_34 {dimension_numbers = #tpu.dot_dimension_numbers<[1], [0], [0], [1], [0, 0, 1, 1], [], []>} : vector<8x16xf32>, vector<16x128xf32>, vector<8x128xf32> -> vector<8x128xf32>
    %54 = arith.addf %52, %53 : vector<8x128xf32>
    %c0_35 = arith.constant 0 : index
    %c2_36 = arith.constant 2 : index
    %c0_37 = arith.constant 0 : index
    %c0_38 = arith.constant 0 : index
    %55 = vector.load %arg5[%c0_35, %c2_36, %c0_37, %c0_38] : memref<1x3x8x128xf32, #tpu.memory_space<vmem>>, vector<1x1x8x128xf32>
    %56 = vector.shape_cast %55 : vector<1x1x8x128xf32> to vector<8x128xf32>
    %57 = vector.shape_cast %54 : vector<8x128xf32> to vector<1x1x8x128xf32>
    tpu.vector_store %arg5[%c0_35, %c2_36, %c0_37, %c0_38], %57 {strides = array<i32>} : memref<1x3x8x128xf32, #tpu.memory_space<vmem>>, vector<1x1x8x128xf32>,
    return
  }
  func.func @transform_0(%arg0: i32, %arg1: i32) -> (i32, i32) {
    %c0_i32 = arith.constant 0 : i32
    %c0_i32_0 = arith.constant 0 : i32
    %c0_i32_1 = arith.constant 0 : i32
    return %c0_i32, %c0_i32_0 : i32, i32
  }
  func.func @transform_1(%arg0: i32, %arg1: i32) -> (i32, i32) {
    %c1_i32 = arith.constant 1 : i32
    %0 = arith.muli %arg0, %c1_i32 : i32
    %1 = arith.addi %0, %arg1 : i32
    %c0_i32 = arith.constant 0 : i32
    %c0_i32_0 = arith.constant 0 : i32
    return %1, %c0_i32 : i32, i32
  }
  func.func @transform_2(%arg0: i32, %arg1: i32) -> (i32, i32) {
    %c1_i32 = arith.constant 1 : i32
    %0 = arith.muli %arg0, %c1_i32 : i32
    %1 = arith.addi %0, %arg1 : i32
    %c0_i32 = arith.constant 0 : i32
    %c0_i32_0 = arith.constant 0 : i32
    return %1, %c0_i32 : i32, i32
  }
  func.func @transform_3(%arg0: i32, %arg1: i32) -> (i32, i32, i32, i32) {
    %c0_i32 = arith.constant 0 : i32
    %c0_i32_0 = arith.constant 0 : i32
    %c0_i32_1 = arith.constant 0 : i32
    %c0_i32_2 = arith.constant 0 : i32
    return %arg0, %c0_i32, %c0_i32_0, %c0_i32_1 : i32, i32, i32, i32
  }
}

</mosaic_0001>

<bundles_post_ra>
// kernel: tpu_custom_call.1
= control target key start
LH: loop header
LB: loop body
LE: loop exit
PB: predicated region body
PF: predicated region fallthrough
CT: control target
= control target key end

     0   :  { %8 = vsyncpa [#allocation3], 0  ;;  %s564_s0 = inlined_call_operand.hbm [shape: f32[8,16], index: 0, kind: input, shape index: {}]   ;;  %s565_s1 = inlined_call_operand.hbm [shape: f32[16,128], index: 1, kind: input, shape index: {}]   ;;  %s566_s2 = inlined_call_operand.hbm [shape: f32[16,128], index: 2, kind: input, shape index: {}]   ;;  %s567_s3 = inlined_call_operand.hbm [shape: f32[1,3,8,128], index: 3, kind: output, shape index: {}]  }
   0x1   :  { %9 = vsyncpa [#allocation6], 0 }
   0x2   :  { %10 = vsyncpa [#allocation4], 0  ;;  %s500_s12 = smov [#allocation5]  }
   0x3   :  { %s30_s13 = sshll.u32 %s500_s12, 4  ;;  %s31_s13 = int_to_ptr.vmem [resolvable:$true] %s30_s13 }
   0x4   :  { %s422_s14 = scalar_lea.vmem %s31_s13, 256  ;;  %p427_p1 = scmp.lt.s32.totalorder %s31_s13, %s31_s13 }
   0x5   :  { %p423_p0 = scmp.ne.s32.totalorder %s31_s13, %s422_s14  ;;  %p428_p2 = scmp.lt.s32.totalorder %s422_s14, %s422_s14 }
   0x7   :  { %p429_p3 = por %p428_p2, %p427_p1 }
   0x9   :  { %p430_p4 = pnand %p429_p3, %p423_p0 }
   0xb   :  { %433 = shalt.err (!%p430_p4)
}
   0xc   :  { %s501_s15 = smov 128   ;;  %s502_s16 = smov 8  }
   0xd   :  { %36 = dma.hbm_to_vmem [thread:$0]  %s565_s1, 256, %s31_s13, [#allocation6], %s501_s15, %s501_s15, %s502_s16  }
   0xe   :  { %s503_s19 = smov [#allocation2]   ;;  %s504_s21 = smov [#allocation7]  }
   0xf   :  { %s17_s20 = sshll.u32 %s503_s19, 4  ;;  %s46_s22 = sshll.u32 %s504_s21, 4  ;;  %s18_s20 = int_to_ptr.vmem [resolvable:$true] %s17_s20  ;;  %s47_s22 = int_to_ptr.vmem [resolvable:$true] %s46_s22 }
  0x10   :  { %s442_s23 = scalar_lea.vmem %s18_s20, 128  ;;  %p447_p6 = scmp.lt.s32.totalorder %s18_s20, %s18_s20 }
  0x11   :  { %p443_p5 = scmp.ne.s32.totalorder %s18_s20, %s442_s23  ;;  %p448_p7 = scmp.lt.s32.totalorder %s442_s23, %s442_s23 }
  0x13   :  { %p449_p8 = por %p448_p7, %p447_p6 }
  0x15   :  { %p450_p9 = pnand %p449_p8, %p443_p5 }
  0x17   :  { %453 = shalt.err (!%p450_p9)
}
  0x18   :  { %20 = dma.hbm_to_vmem [thread:$0]  %s564_s0, 128, %s18_s20, [#allocation3]  }
  0x19   :  { %s462_s26 = scalar_lea.vmem %s47_s22, 256  ;;  %p467_p11 = scmp.lt.s32.totalorder %s47_s22, %s47_s22 }
  0x1a   :  { %p463_p10 = scmp.ne.s32.totalorder %s47_s22, %s462_s26  ;;  %p468_p12 = scmp.lt.s32.totalorder %s462_s26, %s462_s26 }
  0x1c   :  { %p469_p13 = por %p468_p12, %p467_p11 }
  0x1e   :  { %p470_p0 = pnand %p469_p13, %p463_p10 }
  0x20   :  { %473 = shalt.err (!%p470_p0)
}
  0x21   :  { %52 = dma.hbm_to_vmem [thread:$0]  %s566_s2, 256, %s47_s22, [#allocation6], %s501_s15, %s501_s15, %s502_s16  }
  0x22   :  { %494 = dma.done.wait [#allocation3], 128  }
  0x23   :  { %495 = vsyncadd [#allocation3], 4294967168 }
  0x24   :  { %496 = dma.done.wait [#allocation6], 512  }
  0x25   :  { %497 = vsyncadd [#allocation6], 4294966784  ;;  %v505_v0 = vmov 0.0   ;;  %vm506_vm0 = vmmov 0   ;;  %v74_v1 = vld [vmem:[#allocation5 + $0x8] sm:$0xff]  ;;  %v76_v2 = vld [vmem:[#allocation7 + $0x8] sm:$0xff] }
  0x26   :  { %377 = vmatprep.subr.mxu0 %v505_v0  ;;  %381 = vmatprep.mubr.msk.f32.mxu0 %vm506_vm0, %v505_v0  ;;  %v73_v3 = vld [vmem:[#allocation5] sm:$0xff]  ;;  %v81_v4 = vsub.f32 1.0, %v74_v1  ;;  %v83_v5 = vmul.f32 %v76_v2, %v74_v1  ;;  %406 = vlog2.f32 %v74_v1  ;;  %v75_v6 = vld [vmem:[#allocation7] sm:$0xff]  ;;  %v77_v9 = vld [vmem:[#allocation2] sm:$0xff]  ;;  %vm123_vm1 = vcmask 130048   ;;  %s507_s0 = smov [#allocation8]  }
  0x27   :  { %384 = vmatprep.subr.mxu1 %v505_v0  ;;  %388 = vmatprep.mubr.msk.f32.mxu1 %vm506_vm0, %v505_v0  ;;  %v80_v7 = vsub.f32 1.0, %v73_v3  ;;  %v82_v8 = vmul.f32 %v75_v6, %v73_v3  ;;  %v79_v10 = vsub.f32 1.0, %v76_v2  ;;  %v78_v11 = vsub.f32 1.0, %v75_v6  ;;  %s352_s2 = sshll.u32 %s507_s0, 4  ;;  %s353_s2 = int_to_ptr.vmem [resolvable:$true] %s352_s2 }
  0x28   :  { %408 = vlog2.f32 %v81_v4  ;;  %385 = vmatpush3.msra.mxu1 %v83_v5  ;;  %v115_v30 = vmul.f32 -0.5, %v76_v2  ;;  %v114_v37 = vmul.f32 -0.5, %v75_v6  ;;  %v121_v48 = vadd.f32 %v76_v2, %v74_v1  ;;  %s474_s28 = scalar_lea.vmem %s353_s2, 384  ;;  %p479_p2 = scmp.lt.s32.totalorder %s353_s2, %s353_s2 }
  0x29   :  { %410 = vlog2.f32 %v73_v3  ;;  %386 = vmatprep.subr.mxu1 %v505_v0  ;;  %v85_v12 = vmul.f32 %v81_v4, %v79_v10  ;;  %v84_v13 = vmul.f32 %v80_v7, %v78_v11  ;;  %v120_v49 = vadd.f32 %v75_v6, %v73_v3  ;;  %p475_p1 = scmp.ne.s32.totalorder %s353_s2, %s474_s28  ;;  %p480_p3 = scmp.lt.s32.totalorder %s474_s28, %s474_s28 }
  0x2a   :  { %412 = vlog2.f32 %v80_v7  ;;  %387 = vmatpush3.msra.mxu1 %v82_v8  ;;  %v117_v39 = vadd.f32 0.75, %v115_v30  ;;  %v116_v44 = vadd.f32 0.75, %v114_v37 }
  0x2b   :  { %389 = vmatmul.mubr.msk.f32.vlgmr.msra.gmra.mxu1 %vm123_vm1, %v77_v9  ;;  %v87_v15 = vadd.f32 %v85_v12, %v83_v5  ;;  %v86_v21 = vadd.f32 %v84_v13, %v82_v8  ;;  %p481_p4 = por %p480_p3, %p479_p2 }
  0x2d   :  { %v89_v24 = vsub.f32 1.0, %v87_v15  ;;  %v88_v31 = vsub.f32 1.0, %v86_v21  ;;  %p482_p5 = pnand %p481_p4, %p475_p1 }
  0x2f   :  { %v91_v34 = vmul.f32 %v89_v24, %v89_v24  ;;  %v90_v40 = vmul.f32 %v88_v31, %v88_v31 }
  0x33   :  { %v407_v14 = vpop.eup %406 }
  0x34   :  { %v95_v16 = vmul.f32 0.6931472, %v407_v14 }
  0x35   :  { %v409_v17 = vpop.eup %408 }
  0x36   :  { %v411_v18 = vpop.eup %410  ;;  %v97_v19 = vmax.f32 %v95_v16, -100.0  ;;  %v101_v20 = vmul.f32 0.6931472, %v409_v17 }
  0x37   :  { %v413_v22 = vpop.eup %412  ;;  %v93_v23 = vmul.f32 0.6931472, %v411_v18 }
  0x38   :  { %v103_v25 = vmax.f32 %v101_v20, -100.0  ;;  %v105_v26 = vmul.f32 %v97_v19, %v76_v2  ;;  %v99_v27 = vmul.f32 0.6931472, %v413_v22 }
  0x39   :  { %v96_v28 = vmax.f32 %v93_v23, -100.0 }
  0x3a   :  { %v107_v29 = vmul.f32 %v103_v25, %v79_v10  ;;  %v102_v32 = vmax.f32 %v99_v27, -100.0 }
  0x3b   :  { %v104_v33 = vmul.f32 %v96_v28, %v75_v6 }
  0x3c   :  { %v109_v35 = vadd.f32 %v107_v29, %v105_v26  ;;  %v106_v36 = vmul.f32 %v102_v32, %v78_v11 }
  0x3e   :  { %v111_v38 = vsub.f32 0.0, %v109_v35  ;;  %v108_v41 = vadd.f32 %v106_v36, %v104_v33 }
  0x40   :  { %v113_v42 = vmul.f32 %v111_v38, %v91_v34  ;;  %v110_v43 = vsub.f32 0.0, %v108_v41 }
  0x42   :  { %v119_v45 = vmul.f32 %v117_v39, %v113_v42  ;;  %v112_v46 = vmul.f32 %v110_v43, %v90_v40 }
  0x44   :  { %378 = vmatpush3.msra.mxu0 %v119_v45  ;;  %v118_v47 = vmul.f32 %v116_v44, %v112_v46 }
  0x45   :  { %379 = vmatprep.subr.mxu0 %v505_v0 }
  0x46   :  { %380 = vmatpush3.msra.mxu0 %v118_v47 }
  0x47   :  { %382 = vmatmul.mubr.msk.f32.vlgmr.msra.gmra.mxu0 %vm123_vm1, %v77_v9  ;;  %391 = vmatprep.subr.mxu0 %v505_v0 }
  0x48   :  { %392 = vmatpush3.msra.mxu0 %v121_v48  ;;  %395 = vmatprep.mubr.msk.f32.mxu0 %vm506_vm0, %v505_v0 }
  0x49   :  { %393 = vmatprep.subr.mxu0 %v505_v0 }
  0x4a   :  { %394 = vmatpush3.msra.mxu0 %v120_v49 }
  0x4b   :  { %396 = vmatmul.mubr.msk.f32.vlgmr.msra.gmra.mxu0 %vm123_vm1, %v77_v9 }
  0xeb   :  { %v267_v50 = vpop.f32.mrf.mxu1 }
  0xec   :  { %272 = vst [vmem:[#allocation8 + $0x8] sm:$0xff] %v267_v50 }
  0xed   :  { %v390_v51 = vpop.f32.mrf.mxu1 }
 0x107   :  { %v193_v52 = vpop.f32.mrf.mxu0 }
 0x108   :  { %198 = vst [vmem:[#allocation8] sm:$0xff] %v193_v52 }
 0x109   :  { %v383_v53 = vpop.f32.mrf.mxu0 }
 0x10b   :  { %v341_v54 = vpop.f32.mrf.mxu0 }
 0x10c   :  { %346 = vst [vmem:[#allocation8 + $0x10] sm:$0xff] %v341_v54 }
 0x10d   :  { %v397_v55 = vpop.f32.mrf.mxu0 }
 0x10e   :  { %485 = shalt.err (!%p482_p5)
}
 0x10f   :  { %358 = dma.vmem_to_hbm [thread:$0]  %s353_s2, 384, %s567_s3, [#allocation4], %s501_s15, %s501_s15, %s502_s16  }
 0x110   :  { %498 = dma.done.wait [#allocation4], 384  }
 0x111   :  { %499 = vsyncadd [#allocation4], 4294966912 }
 0x112   :  { %362 = vsyncpa [#allocation3], 1 }
 0x113   :  { %363 = vsyncpa [#allocation6], 1 }
 0x114   :  { %364 = vsyncpa [#allocation4], 1 }

</bundles_post_ra>
